<compile_context>
chip_gen: v7x
topology: tpu7x:2x2x1
jax: 0.10.0
libtpu: 0.0.40
codegen_flags: <defaults>
</compile_context>

<pallas_src>
import functools

import jax
import jax.numpy as jnp
from jax import lax
from jax.experimental import pallas as pl
from jax.experimental.pallas import tpu as pltpu


def _lse_pool_kernel(x_ref, o_ref, m_ref, s_ref, *, r, eps, hw, hw_tile, needs_mask):
    """Online LSE over the lane (last) axis.

    grid = (row_blocks, hw_blocks); the hw (reduction) axis is last, "arbitrary".
    m_ref / s_ref: running max / running exp-sum per row (VMEM scratch, resident
    across the reduction axis, init at k == 0, finalized at the last k).
    """
    k = pl.program_id(1)
    last = pl.num_programs(1) - 1

    @pl.when(k == 0)
    def _():
        m_ref[...] = jnp.full_like(m_ref, -jnp.inf)
        s_ref[...] = jnp.zeros_like(s_ref)

    def step(mask_lanes):
        x = x_ref[...].astype(jnp.float32)                    # (rows_blk, hw_tile)
        if mask_lanes:
            # Mask lanes past the true HW extent once (-inf), reused for both the
            # max and the exp: exp(r * (-inf - m_new)) == 0, and m_new is finite
            # because at least one full tile precedes the masked trailing tile.
            col = k * hw_tile + lax.broadcasted_iota(jnp.int32, x.shape, 1)
            x = jnp.where(col < hw, x, -jnp.inf)

        tile_max = jnp.max(x, axis=-1, keepdims=True)         # (rows_blk, 1)
        m_prev = m_ref[...]
        m_new = jnp.maximum(m_prev, tile_max)

        p = jnp.exp(r * (x - m_new))                          # (rows_blk, hw_tile)
        tile_sum = jnp.sum(p, axis=-1, keepdims=True)         # (rows_blk, 1)

        # Rescale the running sum to the new max.  At k == 0, m_prev = -inf so
        # scale = 0 and the (zeroed) running sum stays 0.
        scale = jnp.exp(r * (m_prev - m_new))
        s_ref[...] = s_ref[...] * scale + tile_sum
        m_ref[...] = m_new

    if needs_mask:
        # Fast unmasked path for every full tile; mask work only on the last one.
        @pl.when(k < last)
        def _():
            step(False)

        @pl.when(k == last)
        def _():
            step(True)
    else:
        step(False)

    @pl.when(k == last)
    def _():
        mean = s_ref[...] * (1.0 / hw)                        # divide by true HW
        lse = m_ref[...] + (1.0 / r) * jnp.log(eps + mean)
        o_ref[...] = lse.astype(o_ref.dtype)


def lse_pooling(x, r=10, eps=1e-6, *, max_hw_tile=4096,
                vmem_input_budget_bytes=8 * 1024 * 1024):
    """LSEPooling forward.  x: (B, C, H, W) -> (B, C) float32."""
    B, C, H, W = x.shape
    rows = B * C
    hw = H * W
    # No jnp.pad: partial trailing blocks are handled by the grid; garbage rows
    # of a partial row block are strictly per-row and clipped on store.
    x2d = x.reshape(rows, hw)

    # Reduction (lane) tile: full extent if it fits; otherwise the largest
    # 128-multiple <= max_hw_tile that divides hw evenly (no mask ever emitted);
    # fall back to a masked trailing tile only if no such divisor exists.
    assert max_hw_tile % 128 == 0 and max_hw_tile >= 128
    if hw <= max_hw_tile:
        hw_tile = hw
        needs_mask = False
    else:
        hw_tile = 0
        t = max_hw_tile
        while t >= 128:
            if hw % t == 0:
                hw_tile = t
                break
            t -= 128
        if hw_tile == 0:
            hw_tile = max_hw_tile
            needs_mask = True
        else:
            needs_mask = False

    # Row tile: as many rows (multiple of 8) as fit the VMEM budget for the
    # double-buffered input tile, sized against the *input* itemsize (the f32
    # upcast / exp temporaries live in vregs, not full-tile VMEM copies).
    itemsize = jnp.dtype(x.dtype).itemsize
    block_rows = vmem_input_budget_bytes // (2 * hw_tile * itemsize)
    block_rows = max(8, (min(block_rows, 2048) // 8) * 8)
    rows_ceil8 = ((rows + 7) // 8) * 8
    block_rows = min(block_rows, rows_ceil8)
    # Split the row ("parallel") axis into >= 2 blocks when rows permit so both
    # TensorCores get work on v7x; neutral on single-TC chips.
    if rows_ceil8 >= 16:
        half = (((rows_ceil8 + 1) // 2 + 7) // 8) * 8
        block_rows = min(block_rows, half)

    grid = (pl.cdiv(rows, block_rows), pl.cdiv(hw, hw_tile))

    # VMEM limit derived from the actual footprint: double-buffered input tiles
    # plus the lane-padded (block_rows, 1)->(block_rows, 128) f32 scratch and
    # output buffers, with ~1.5x headroom.  Stays well inside v7x's 64 MiB.
    in_bytes = 2 * block_rows * hw_tile * itemsize
    aux_bytes = 4 * block_rows * 128 * 4
    vmem_limit = int(min(max((in_bytes + aux_bytes) * 3 // 2, 16 * 1024 * 1024),
                         64 * 1024 * 1024))

    kernel = functools.partial(
        _lse_pool_kernel, r=float(r), eps=float(eps),
        hw=hw, hw_tile=hw_tile, needs_mask=needs_mask)

    out = pl.pallas_call(
        kernel,
        out_shape=jax.ShapeDtypeStruct((rows, 1), jnp.float32),
        grid_spec=pltpu.PrefetchScalarGridSpec(
            num_scalar_prefetch=0,
            grid=grid,
            in_specs=[pl.BlockSpec((block_rows, hw_tile), lambda i, k: (i, k))],
            out_specs=pl.BlockSpec((block_rows, 1), lambda i, k: (i, 0)),
            scratch_shapes=[
                pltpu.VMEM((block_rows, 1), jnp.float32),    # running max
                pltpu.VMEM((block_rows, 1), jnp.float32),    # running exp-sum
            ],
        ),
        compiler_params=pltpu.CompilerParams(
            dimension_semantics=("parallel", "arbitrary"),
            vmem_limit_bytes=vmem_limit,
        ),
    )(x2d)

    return out[:, 0].reshape(B, C)


def _reference(x, r=10, eps=1e-6):
    B, C = x.shape[0], x.shape[1]
    xf = x.reshape(B, C, -1).astype(jnp.float32)
    x_max = jnp.max(xf, axis=2, keepdims=True)
    x_exp = jnp.exp(r * (xf - x_max))
    x_lse = x_max + (1.0 / r) * jnp.log(eps + jnp.mean(x_exp, axis=2, keepdims=True))
    return x_lse[..., 0]


if __name__ == "__main__":
    key = jax.random.PRNGKey(0)
    k0, k1, k2, k3 = jax.random.split(key, 4)

    # 1) Primary shape from the module spec: (B, C, H, W) = (2, 4, 16, 16).
    x = jax.random.normal(k0, (2, 4, 16, 16), dtype=jnp.float32)
    out = jax.block_until_ready(lse_pooling(x, r=10, eps=1e-6))
    ref = _reference(x, r=10, eps=1e-6)
    assert out.shape == (2, 4), out.shape
    assert jnp.allclose(out, ref, atol=1e-5, rtol=1e-5), (out, ref)

    # 2) Non-128-multiple hw with the default (full-extent) tile: exercises the
    #    lane-padded single-block path.
    x2 = jax.random.normal(k1, (2, 4, 18, 18), dtype=jnp.float32)
    out2 = jax.block_until_ready(lse_pooling(x2, r=10, eps=1e-6))
    ref2 = _reference(x2, r=10, eps=1e-6)
    assert jnp.allclose(out2, ref2, atol=1e-5, rtol=1e-5), (out2, ref2)

    # 3) Tiled reduction with a masked trailing tile (no 128-multiple divisor of
    #    324 <= 256): exercises the gated masked path + online LSE.
    out3 = jax.block_until_ready(lse_pooling(x2, r=10, eps=1e-6, max_hw_tile=256))
    assert jnp.allclose(out3, ref2, atol=1e-5, rtol=1e-5), (out3, ref2)

    # 4) Tiled reduction where an even 128-multiple divisor exists (hw=1536,
    #    tile=512, 3 identical unmasked steps): exercises the divisor search.
    x4 = jax.random.normal(k2, (2, 4, 32, 48), dtype=jnp.float32)
    out4 = jax.block_until_ready(lse_pooling(x4, r=10, eps=1e-6, max_hw_tile=512))
    ref4 = _reference(x4, r=10, eps=1e-6)
    assert jnp.allclose(out4, ref4, atol=1e-5, rtol=1e-5), (out4, ref4)

    # 5) bf16 input: dtype-aware block sizing + in-kernel f32 upcast.
    x5 = jax.random.normal(k3, (2, 4, 16, 16), dtype=jnp.bfloat16)
    out5 = jax.block_until_ready(lse_pooling(x5, r=10, eps=1e-6))
    ref5 = _reference(x5, r=10, eps=1e-6)
    assert jnp.allclose(out5, ref5, atol=1e-4, rtol=1e-4), (out5, ref5)

    print("KERNEL_OK")
</pallas_src>

<mosaic_0001>
module attributes {stable_mosaic.version = 11 : i64} {
  func.func @_lse_pool_kernel(%arg0: i32, %arg1: i32, %arg2: memref<8x256xf32, #tpu.memory_space<vmem>>, %arg3: memref<8x1xf32, #tpu.memory_space<vmem>>, %arg4: memref<8x1xf32, #tpu.memory_space<vmem>>, %arg5: memref<8x1xf32, #tpu.memory_space<vmem>>) attributes {dimension_semantics = [#tpu.dimension_semantics<parallel>, #tpu.dimension_semantics<arbitrary>], iteration_bounds = array<i64: 1, 1>, scalar_prefetch = 0 : i64, scratch_operands = 2 : i64, tpu.core_type = #tpu.core_type<tc>, window_params = [{transform_indices = @transform_0, window_bounds = array<i64: 8, 256>}, {transform_indices = @transform_1, window_bounds = array<i64: 8, 1>}]} {
    %c0_i32 = arith.constant 0 : i32
    %0 = arith.cmpi eq, %arg1, %c0_i32 : i32
    %1 = arith.extui %0 : i1 to i32
    %c0_i32_0 = arith.constant 0 : i32
    %2 = arith.cmpi ne, %1, %c0_i32_0 : i32
    scf.if %2 {
      %cst_15 = arith.constant 0xFF800000 : f32
      %27 = vector.broadcast %cst_15 : f32 to vector<8x1xf32>
      %c0_16 = arith.constant 0 : index
      %c0_17 = arith.constant 0 : index
      %28 = vector.load %arg4[%c0_16, %c0_17] : memref<8x1xf32, #tpu.memory_space<vmem>>, vector<8x1xf32>
      tpu.vector_store %arg4[%c0_16, %c0_17], %27 {strides = array<i32>} : memref<8x1xf32, #tpu.memory_space<vmem>>, vector<8x1xf32>,
      %cst_18 = arith.constant 0.000000e+00 : f32
      %29 = vector.broadcast %cst_18 : f32 to vector<8x1xf32>
      %c0_19 = arith.constant 0 : index
      %c0_20 = arith.constant 0 : index
      %30 = vector.load %arg5[%c0_19, %c0_20] : memref<8x1xf32, #tpu.memory_space<vmem>>, vector<8x1xf32>
      tpu.vector_store %arg5[%c0_19, %c0_20], %29 {strides = array<i32>} : memref<8x1xf32, #tpu.memory_space<vmem>>, vector<8x1xf32>,
    } else {
    }
    %c0 = arith.constant 0 : index
    %c0_1 = arith.constant 0 : index
    %3 = vector.load %arg2[%c0, %c0_1] : memref<8x256xf32, #tpu.memory_space<vmem>>, vector<8x256xf32>
    %cst = arith.constant dense<0xFF800000> : vector<8xf32>
    %4 = vector.multi_reduction <maximumf>, %3, %cst [1] : vector<8x256xf32> to vector<8xf32>
    %5 = vector.shape_cast %4 : vector<8xf32> to vector<8x1xf32>
    %c0_2 = arith.constant 0 : index
    %c0_3 = arith.constant 0 : index
    %6 = vector.load %arg4[%c0_2, %c0_3] : memref<8x1xf32, #tpu.memory_space<vmem>>, vector<8x1xf32>
    %7 = arith.maximumf %6, %5 : vector<8x1xf32>
    %8 = vector.broadcast %7 : vector<8x1xf32> to vector<8x256xf32>
    %9 = arith.subf %3, %8 : vector<8x256xf32>
    %cst_4 = arith.constant 1.000000e+01 : f32
    %10 = vector.broadcast %cst_4 : f32 to vector<8x256xf32>
    %11 = arith.mulf %10, %9 : vector<8x256xf32>
    %12 = math.exp %11 : vector<8x256xf32>
    %cst_5 = arith.constant dense<0.000000e+00> : vector<8xf32>
    %13 = vector.multi_reduction <add>, %12, %cst_5 [1] : vector<8x256xf32> to vector<8xf32>
    %14 = vector.shape_cast %13 : vector<8xf32> to vector<8x1xf32>
    %15 = arith.subf %6, %7 : vector<8x1xf32>
    %cst_6 = arith.constant 1.000000e+01 : f32
    %16 = vector.broadcast %cst_6 : f32 to vector<8x1xf32>
    %17 = arith.mulf %16, %15 : vector<8x1xf32>
    %18 = math.exp %17 : vector<8x1xf32>
    %c0_7 = arith.constant 0 : index
    %c0_8 = arith.constant 0 : index
    %19 = vector.load %arg5[%c0_7, %c0_8] : memref<8x1xf32, #tpu.memory_space<vmem>>, vector<8x1xf32>
    %20 = arith.mulf %19, %18 : vector<8x1xf32>
    %21 = arith.addf %20, %14 : vector<8x1xf32>
    %c0_9 = arith.constant 0 : index
    %c0_10 = arith.constant 0 : index
    %22 = vector.load %arg5[%c0_9, %c0_10] : memref<8x1xf32, #tpu.memory_space<vmem>>, vector<8x1xf32>
    tpu.vector_store %arg5[%c0_9, %c0_10], %21 {strides = array<i32>} : memref<8x1xf32, #tpu.memory_space<vmem>>, vector<8x1xf32>,
    %c0_11 = arith.constant 0 : index
    %c0_12 = arith.constant 0 : index
    %23 = vector.load %arg4[%c0_11, %c0_12] : memref<8x1xf32, #tpu.memory_space<vmem>>, vector<8x1xf32>
    tpu.vector_store %arg4[%c0_11, %c0_12], %7 {strides = array<i32>} : memref<8x1xf32, #tpu.memory_space<vmem>>, vector<8x1xf32>,
    %c0_i32_13 = arith.constant 0 : i32
    %24 = arith.cmpi eq, %arg1, %c0_i32_13 : i32
    %25 = arith.extui %24 : i1 to i32
    %c0_i32_14 = arith.constant 0 : i32
    %26 = arith.cmpi ne, %25, %c0_i32_14 : i32
    scf.if %26 {
      %c0_15 = arith.constant 0 : index
      %c0_16 = arith.constant 0 : index
      %27 = vector.load %arg5[%c0_15, %c0_16] : memref<8x1xf32, #tpu.memory_space<vmem>>, vector<8x1xf32>
      %cst_17 = arith.constant 3.906250e-03 : f32
      %28 = vector.broadcast %cst_17 : f32 to vector<8x1xf32>
      %29 = arith.mulf %27, %28 : vector<8x1xf32>
      %c0_18 = arith.constant 0 : index
      %c0_19 = arith.constant 0 : index
      %30 = vector.load %arg4[%c0_18, %c0_19] : memref<8x1xf32, #tpu.memory_space<vmem>>, vector<8x1xf32>
      %cst_20 = arith.constant 9.99999997E-7 : f32
      %31 = vector.broadcast %cst_20 : f32 to vector<8x1xf32>
      %32 = arith.addf %31, %29 : vector<8x1xf32>
      %33 = math.log %32 : vector<8x1xf32>
      %cst_21 = arith.constant 1.000000e-01 : f32
      %34 = vector.broadcast %cst_21 : f32 to vector<8x1xf32>
      %35 = arith.mulf %34, %33 : vector<8x1xf32>
      %36 = arith.addf %30, %35 : vector<8x1xf32>
      %c0_22 = arith.constant 0 : index
      %c0_23 = arith.constant 0 : index
      %37 = vector.load %arg3[%c0_22, %c0_23] : memref<8x1xf32, #tpu.memory_space<vmem>>, vector<8x1xf32>
      tpu.vector_store %arg3[%c0_22, %c0_23], %36 {strides = array<i32>} : memref<8x1xf32, #tpu.memory_space<vmem>>, vector<8x1xf32>,
    } else {
    }
    return
  }
  func.func @transform_0(%arg0: i32, %arg1: i32) -> (i32, i32) {
    %c0_i32 = arith.constant 0 : i32
    return %arg0, %arg1 : i32, i32
  }
  func.func @transform_1(%arg0: i32, %arg1: i32) -> (i32, i32) {
    %c0_i32 = arith.constant 0 : i32
    %c0_i32_0 = arith.constant 0 : i32
    return %arg0, %c0_i32 : i32, i32
  }
}

</mosaic_0001>

<bundles_post_ra>
// kernel: tpu_custom_call.1
= control target key start
LH: loop header
LB: loop body
LE: loop exit
PB: predicated region body
PF: predicated region fallthrough
CT: control target
= control target key end

     0   :  { %6 = vsyncpa [#allocation5], 0  ;;  %s114_s6 = smov [#allocation4]   ;;  %s148_s0 = inlined_call_operand.hbm [shape: f32[8,256], index: 0, kind: input, shape index: {}]   ;;  %s149_s1 = inlined_call_operand.vmem [shape: f32[8,1], index: 1, kind: output, shape index: {}]  }
   0x1   :  { %s13_s7 = sshll.u32 %s114_s6, 4  ;;  %s90_s10 = scalar_lea.hbm %s148_s0, 256  ;;  %s14_s7 = int_to_ptr.vmem [resolvable:$true] %s13_s7 }
   0x2   :  { %p91_p0 = scmp.ne.s32.totalorder %s148_s0, %s90_s10  ;;  %p94_p1 = scmp.lt.u32.totalorder %s90_s10, %s148_s0 }
   0x4   :  { %p96_p2 = pnand %p94_p1, %p91_p0 }
   0x6   :  { %99 = shalt.err (!%p96_p2)
}
   0x7   :  { %s100_s15 = scalar_lea.vmem %s14_s7, 256  ;;  %p105_p4 = scmp.lt.s32.totalorder %s14_s7, %s14_s7 }
   0x8   :  { %p101_p3 = scmp.ne.s32.totalorder %s14_s7, %s100_s15  ;;  %p106_p5 = scmp.lt.s32.totalorder %s100_s15, %s100_s15 }
   0xa   :  { %p107_p6 = por %p106_p5, %p105_p4 }
   0xc   :  { %p108_p7 = pnand %p107_p6, %p101_p3 }
   0xe   :  { %111 = shalt.err (!%p108_p7)
}
   0xf   :  { %16 = dma.hbm_to_vmem [thread:$0]  %s148_s0, 256, %s14_s7, [#allocation5]  }
  0x10   :  { %112 = dma.done.wait [#allocation5], 256  }
  0x11   :  { %113 = vsyncadd [#allocation5], 4294967040  ;;  %vm24_vm0 = vcmask 7168   ;;  %v115_v0 = vmov -inf   ;;  %v27_v1 = vld [vmem:[#allocation4] sm:$0xff]  ;;  %v28_v2 = vld [vmem:[#allocation4 + $0x8] sm:$0xff] }
  0x12   :  { %25 = vst.msk [vmem:[#allocation2] sm:$0xff] %vm24_vm0, %v115_v0  ;;  %v29_v3 = vmax.f32 %v27_v1, %v28_v2  ;;  %v116_v4 = vmov 0   ;;  %v117_v5 = vmov 0.0  }
  0x13   :  { %81 = vset.pattern.permute.xlu0 %v116_v4  ;;  %26 = vst.msk [vmem:[#allocation3] sm:$0xff] %vm24_vm0, %v117_v5 }
  0x14   :  { %30 = vmax.xlane.f32.xlu0 %v29_v3 }
  0x19   :  { %v32_v6 = vld [vmem:[#allocation2] sm:$0xff] }
  0x1a   :  { %v54_v23 = vld [vmem:[#allocation3] sm:$0xff] }
  0xa1   :  { %v31_v7 = vpop.xlane.xlu0 %30 }
  0xa2   :  { %v33_v8 = vmax.f32 %v32_v6, %v31_v7 }
  0xa4   :  { %v50_v9 = vsub.f32 %v32_v6, %v33_v8  ;;  %59 = vst.msk [vmem:[#allocation2] sm:$0xff] %vm24_vm0, %v33_v8  ;;  %36 = vperm.xlu0 %81, %v33_v8  }
  0xa6   :  { %v51_v20 = vmul.f32 10.0, %v50_v9 }
  0xa8   :  { %v52_v21 = vmul.f32 1.442695, %v51_v20 }
  0xab   :  { %v65_v33 = vld [vmem:[#allocation2] sm:$0xff] }
 0x123   :  { %v37_v10 = vpop.permute.xlu0 %36 }
 0x124   :  { %v39_v11 = vsub.f32 %v27_v1, %v37_v10  ;;  %v40_v12 = vsub.f32 %v28_v2, %v37_v10 }
 0x126   :  { %v41_v13 = vmul.f32 10.0, %v39_v11  ;;  %v42_v14 = vmul.f32 10.0, %v40_v12 }
 0x128   :  { %v43_v15 = vmul.f32 1.442695, %v41_v13  ;;  %v45_v16 = vmul.f32 1.442695, %v42_v14 }
 0x12a   :  { %82 = vpow2.f32 %v43_v15 }
 0x12b   :  { %84 = vpow2.f32 %v45_v16 }
 0x12c   :  { %86 = vpow2.f32 %v52_v21 }
 0x134   :  { %v83_v17 = vpop.eup %82 }
 0x135   :  { %v85_v18 = vpop.eup %84 }
 0x136   :  { %v47_v19 = vadd.f32 %v85_v18, %v83_v17  ;;  %v87_v22 = vpop.eup %86 }
 0x137   :  { %v55_v24 = vmul.f32 %v87_v22, %v54_v23 }
 0x138   :  { %48 = vadd.xlane.f32.xlu1 %v47_v19 }
 0x1c5   :  { %v49_v25 = vpop.xlane.xlu1 %48 }
 0x1c6   :  { %v56_v26 = vadd.f32 %v55_v24, %v49_v25 }
 0x1c8   :  { %58 = vst.msk [vmem:[#allocation3] sm:$0xff] %vm24_vm0, %v56_v26 }
 0x1cf   :  { %v63_v27 = vld [vmem:[#allocation3] sm:$0xff] }
 0x1d0   :  { %v64_v28 = vmul.f32 0.00390625, %v63_v27 }
 0x1d2   :  { %v66_v29 = vadd.f32 1e-06, %v64_v28 }
 0x1d4   :  { %88 = vlog2.f32 %v66_v29 }
 0x1de   :  { %v89_v30 = vpop.eup %88 }
 0x1df   :  { %v68_v31 = vmul.f32 0.6931472, %v89_v30 }
 0x1e1   :  { %v69_v32 = vmul.f32 0.1, %v68_v31 }
 0x1e3   :  { %v70_v34 = vadd.f32 %v69_v32, %v65_v33 }
 0x1e5   :  { %71 = vst.msk [vmem:[%s149_s1] sm:$0xff] %vm24_vm0, %v70_v34 }
 0x1e6   :  { %76 = vsyncpa [#allocation5], 1 }

</bundles_post_ra>
